<compile_context>
chip_gen: v6e
topology: v6e:2x2x1
jax: 0.10.0
libtpu: 0.0.40
codegen_flags: <defaults>
</compile_context>

<pallas_src>
import functools

import jax
import jax.numpy as jnp
from jax.experimental import pallas as pl
from jax.experimental.pallas import tpu as pltpu


def _round_up(v: int, m: int) -> int:
    return (v + m - 1) // m * m


def _choose_tile(L_out, C, C_out, max_block_rows, granule, n_batch):
    """Largest output-row tile that (a) is a multiple of `granule`, (b) keeps the
    double-buffered working set inside ~26 MiB (fits v7x's 32 MiB scoped VMEM with
    headroom; v5e/v6e have 128 MiB physical), and (c) leaves >= 2 grid blocks for
    v7x's two TensorCores when the batch is 1."""
    itemsize = 4
    w_bytes = 2 * (3 * C * C_out + C_out) * itemsize        # weights + bias, 2 buffers
    halo_bytes = 2 * 8 * 2 * C * itemsize                   # halo tile, 2 buffers
    row_bytes = 2 * (2 * C + C_out) * itemsize              # x01 row + out row, 2 buffers
    budget = 26 * 1024 * 1024
    avail = budget - w_bytes - halo_bytes

    cap = granule
    if avail >= granule * row_bytes:
        cap = (avail // row_bytes) // granule * granule
    cap = min(cap, max(granule, max_block_rows // granule * granule))

    tl = max(granule, min(cap, _round_up(L_out, granule)))
    if n_batch == 1:
        # Megacore: make sure there are >= 2 grid blocks to shard across TensorCores.
        tl = max(granule, min(tl, _round_up(pl.cdiv(L_out, 2), granule)))
    return tl


def _downsample_kernel(x01_ref, halo_ref, w01_ref, w2_ref, b_ref, o_ref, *, C, TL, write_ncl):
    """One TL-row tile of the stride-2, K=3 conv.

    x01_ref : (TL, 2C)    row j = [x_pad[2j, :], x_pad[2j+1, :]]   (taps 0 and 1)
    halo_ref: (8, 2C)     rows (l+1)*TL .. of the SAME folded buffer; its first row's
                          first C lanes are x_pad[2*(l+1)*TL] = tap 2 of this tile's last row
    w01_ref : (2C, C_out) [W_tap0 ; W_tap1] stacked on the contraction axis
    w2_ref  : (C,  C_out)  W_tap2
    b_ref   : (1,  C_out)
    o_ref   : (TL, C_out) [NLC fallback]   or   (C_out, TL) [NCL direct]
    """
    x01 = x01_ref[...]                                                    # (TL, 2C)

    # Taps 0/1: one MXU matmul over the folded (position-pair x channel) axis.
    acc = jnp.dot(x01, w01_ref[...], preferred_element_type=jnp.float32)

    # Tap 2: x_pad[2j+2] is the next even element, i.e. row j+1 of the even stream.
    # Append the 8-row halo and shift by one row -- no duplicated activation in HBM.
    ev_ext = jnp.concatenate([x01, halo_ref[...]], axis=0)                # (TL+8, 2C)
    x2 = ev_ext[1:TL + 1, :C]                                             # (TL, C)
    acc = acc + jnp.dot(x2, w2_ref[...], preferred_element_type=jnp.float32)

    acc = acc + b_ref[...]                                                # (TL, C_out), f32

    if write_ncl:
        # XLU transpose of the small accumulator -> output stored NCL directly,
        # so the wrapper needs no extra output-transpose HBM pass.
        o_ref[...] = jnp.transpose(acc).astype(o_ref.dtype)               # (C_out, TL)
    else:
        o_ref[...] = acc.astype(o_ref.dtype)                              # (TL, C_out)


def downsample(x, weight, bias, *, max_block_rows=1024, compute_dtype=None):
    """x: (N, C, L); weight: (C_out, C_in, 3); bias: (C_out,) -> (N, C_out, L_out)."""
    N, C, L = x.shape
    C_out, C_in, K = weight.shape
    assert K == 3 and C_in == C and C_out == C

    out_dtype = x.dtype
    act_dtype = jnp.dtype(compute_dtype) if compute_dtype is not None else x.dtype

    # F.pad(x, (0, 1)) then Conv1d(kernel=3, stride=2, padding=0).
    L_out = (L + 1 - K) // 2 + 1
    assert L_out >= 1

    # NCL-direct output only when channels are lane-aligned (in-kernel transpose and
    # (C_out, TL) stores are clean/lane-dense there); otherwise lane-dense NLC output.
    write_ncl = (C_out % 128 == 0)
    granule = 128 if write_ncl else 8

    TL = _choose_tile(L_out, C, C_out, max_block_rows, granule, N)
    num_l_blocks = pl.cdiv(L_out, TL)
    L_out_pad = num_l_blocks * TL

    # Channels-last + zero pad.  Position L is the module's explicit right-pad zero; the
    # extra zero rows (i) only feed output rows >= L_out which are sliced off, and
    # (ii) keep every 8-row halo block fully in-bounds.  transpose+pad+reshape fuse into
    # a single HBM copy pass under XLA.
    L_big = 2 * (L_out_pad + 8)
    x_nlc = jnp.transpose(x, (0, 2, 1)).astype(act_dtype)                 # (N, L, C)
    x_nlc = jnp.pad(x_nlc, ((0, 0), (0, L_big - L), (0, 0)))              # (N, L_big, C)
    # Fold position pairs (2j, 2j+1) onto the channel axis -> free reshape.  This single
    # buffer feeds all three taps (tap 2 via the in-kernel halo shift above).
    x01 = x_nlc.reshape(N, L_out_pad + 8, 2 * C)                          # (N, Lp+8, 2C)

    # Weight (C_out, C_in, 3) -> per-tap (C_in, C_out) matrices.
    w_t = jnp.transpose(weight, (2, 1, 0)).astype(act_dtype)              # (3, C_in, C_out)
    w01 = w_t[:2].reshape(2 * C_in, C_out)                                # (2C, C_out)
    w2 = w_t[2]                                                           # (C, C_out)
    b2 = bias.reshape(1, C_out).astype(jnp.float32)

    kernel = functools.partial(_downsample_kernel, C=C, TL=TL, write_ncl=write_ncl)

    if write_ncl:
        out_shape = jax.ShapeDtypeStruct((N, C_out, L_out_pad), out_dtype)
        out_spec = pl.BlockSpec((None, C_out, TL), lambda n, l: (n, 0, l))
    else:
        out_shape = jax.ShapeDtypeStruct((N, L_out_pad, C_out), out_dtype)
        out_spec = pl.BlockSpec((None, TL, C_out), lambda n, l: (n, l, 0))

    halo_blk = TL // 8  # halo block index stride (8-row blocks over the same buffer)

    out = pl.pallas_call(
        kernel,
        out_shape=out_shape,
        grid=(N, num_l_blocks),
        in_specs=[
            # Main activation tile (taps 0/1 + body of tap 2).
            pl.BlockSpec((None, TL, 2 * C), lambda n, l: (n, l, 0)),
            # 8-row halo from the next tile (supplies tap 2 of this tile's last row).
            pl.BlockSpec((None, 8, 2 * C), lambda n, l: (n, (l + 1) * halo_blk, 0)),
            # Resident weights / bias (constant index maps -> DMA'd once).
            pl.BlockSpec((2 * C, C_out), lambda n, l: (0, 0)),
            pl.BlockSpec((C, C_out), lambda n, l: (0, 0)),
            pl.BlockSpec((1, C_out), lambda n, l: (0, 0)),
        ],
        out_specs=out_spec,
        compiler_params=pltpu.CompilerParams(
            dimension_semantics=("parallel", "parallel"),   # shard over both TCs on v7x
            vmem_limit_bytes=32 * 1024 * 1024,              # TL budget keeps us ~26 MiB
        ),
    )(x01, x01, w01, w2, b2)

    if write_ncl:
        return out[:, :, :L_out]                                          # already NCL
    return jnp.transpose(out[:, :L_out, :], (0, 2, 1))                    # NLC -> NCL


def reference(x, weight, bias):
    x_pad = jnp.pad(x, ((0, 0), (0, 0), (0, 1)))
    y = jax.lax.conv_general_dilated(
        x_pad, weight, window_strides=(2,), padding="VALID",
        dimension_numbers=("NCH", "OIH", "NCH"),
    )
    return y + bias[None, :, None]


def _make_params(key, C):
    kw, kb = jax.random.split(key)
    fan_in = C * 3
    bound = 1.0 / (fan_in ** 0.5)
    weight = jax.random.uniform(kw, (C, C, 3), jnp.float32, -bound, bound)
    bias = jax.random.uniform(kb, (C,), jnp.float32, -bound, bound)
    return weight, bias


if __name__ == "__main__":
    key = jax.random.PRNGKey(0)
    k1, k2, k3, k4 = jax.random.split(key, 4)

    # Case 1: small shapes consistent with the module (exercises the small-C fallback path).
    N, C, L = 2, 4, 16
    x = jax.random.normal(k1, (N, C, L), dtype=jnp.float32)
    weight, bias = _make_params(k2, C)
    out = jax.block_until_ready(downsample(x, weight, bias))
    ref = reference(x, weight, bias)
    L_out = (L + 1 - 3) // 2 + 1
    assert out.shape == (N, C, L_out), out.shape
    assert jnp.allclose(out, ref, atol=1e-5, rtol=1e-5), float(jnp.max(jnp.abs(out - ref)))

    # Case 2: lane-aligned channels, odd length, batch 1, multi-tile grid
    # (exercises the halo across a real tile boundary, the NCL-direct store path,
    #  and the >=2-block megacore split).
    N2, C2, L2 = 1, 128, 509
    x2 = jax.random.normal(k3, (N2, C2, L2), dtype=jnp.float32)
    weight2, bias2 = _make_params(k4, C2)
    out2 = jax.block_until_ready(downsample(x2, weight2, bias2, max_block_rows=128))
    ref2 = reference(x2, weight2, bias2)
    L_out2 = (L2 + 1 - 3) // 2 + 1
    assert out2.shape == (N2, C2, L_out2), out2.shape
    assert jnp.allclose(out2, ref2, atol=1e-4, rtol=1e-4), float(jnp.max(jnp.abs(out2 - ref2)))

    print("KERNEL_OK")
</pallas_src>

<mosaic_0001>
module attributes {stable_mosaic.version = 11 : i64} {
  func.func @_downsample_kernel(%arg0: i32, %arg1: i32, %arg2: memref<1x8x8xf32, #tpu.memory_space<vmem>>, %arg3: memref<1x8x8xf32, #tpu.memory_space<vmem>>, %arg4: memref<8x4xf32, #tpu.memory_space<vmem>>, %arg5: memref<4x4xf32, #tpu.memory_space<vmem>>, %arg6: memref<1x4xf32, #tpu.memory_space<vmem>>, %arg7: memref<1x8x4xf32, #tpu.memory_space<vmem>>) attributes {dimension_semantics = [#tpu.dimension_semantics<parallel>, #tpu.dimension_semantics<parallel>], iteration_bounds = array<i64: 2, 1>, scalar_prefetch = 0 : i64, scratch_operands = 0 : i64, tpu.core_type = #tpu.core_type<tc>, window_params = [{transform_indices = @transform_0, window_bounds = array<i64: 1, 8, 8>}, {transform_indices = @transform_1, window_bounds = array<i64: 1, 8, 8>}, {pipeline_mode = #tpu.pipeline_mode<synchronous>, transform_indices = @transform_2, window_bounds = array<i64: 8, 4>}, {pipeline_mode = #tpu.pipeline_mode<synchronous>, transform_indices = @transform_3, window_bounds = array<i64: 4, 4>}, {pipeline_mode = #tpu.pipeline_mode<synchronous>, transform_indices = @transform_4, window_bounds = array<i64: 1, 4>}, {transform_indices = @transform_5, window_bounds = array<i64: 1, 8, 4>}]} {
    %c0 = arith.constant 0 : index
    %c0_0 = arith.constant 0 : index
    %c0_1 = arith.constant 0 : index
    %0 = vector.load %arg2[%c0, %c0_0, %c0_1] : memref<1x8x8xf32, #tpu.memory_space<vmem>>, vector<1x8x8xf32>
    %1 = vector.shape_cast %0 : vector<1x8x8xf32> to vector<8x8xf32>
    %c0_2 = arith.constant 0 : index
    %c0_3 = arith.constant 0 : index
    %2 = vector.load %arg4[%c0_2, %c0_3] : memref<8x4xf32, #tpu.memory_space<vmem>>, vector<8x4xf32>
    %cst = arith.constant dense<0.000000e+00> : vector<8x4xf32>
    %3 = tpu.matmul %1, %2, %cst {dimension_numbers = #tpu.dot_dimension_numbers<[1], [0], [0], [1], [0, 0, 1, 1], [], []>} : vector<8x8xf32>, vector<8x4xf32>, vector<8x4xf32> -> vector<8x4xf32>
    %c0_4 = arith.constant 0 : index
    %c0_5 = arith.constant 0 : index
    %c0_6 = arith.constant 0 : index
    %4 = vector.load %arg3[%c0_4, %c0_5, %c0_6] : memref<1x8x8xf32, #tpu.memory_space<vmem>>, vector<1x8x8xf32>
    %5 = vector.shape_cast %4 : vector<1x8x8xf32> to vector<8x8xf32>
    %6 = tpu.concatenate %1, %5 in 0 : vector<8x8xf32>, vector<8x8xf32> -> vector<16x8xf32>
    %7 = vector.extract_strided_slice %6 {offsets = [1, 0], sizes = [8, 4], strides = [1, 1]} : vector<16x8xf32> to vector<8x4xf32>
    %c0_7 = arith.constant 0 : index
    %c0_8 = arith.constant 0 : index
    %8 = vector.load %arg5[%c0_7, %c0_8] : memref<4x4xf32, #tpu.memory_space<vmem>>, vector<4x4xf32>
    %cst_9 = arith.constant dense<0.000000e+00> : vector<8x4xf32>
    %9 = tpu.matmul %7, %8, %cst_9 {dimension_numbers = #tpu.dot_dimension_numbers<[1], [0], [0], [1], [0, 0, 1, 1], [], []>} : vector<8x4xf32>, vector<4x4xf32>, vector<8x4xf32> -> vector<8x4xf32>
    %10 = arith.addf %3, %9 : vector<8x4xf32>
    %c0_10 = arith.constant 0 : index
    %c0_11 = arith.constant 0 : index
    %11 = vector.load %arg6[%c0_10, %c0_11] : memref<1x4xf32, #tpu.memory_space<vmem>>, vector<1x4xf32>
    %12 = vector.broadcast %11 : vector<1x4xf32> to vector<8x4xf32>
    %13 = arith.addf %10, %12 : vector<8x4xf32>
    %c0_12 = arith.constant 0 : index
    %c0_13 = arith.constant 0 : index
    %c0_14 = arith.constant 0 : index
    %14 = vector.load %arg7[%c0_12, %c0_13, %c0_14] : memref<1x8x4xf32, #tpu.memory_space<vmem>>, vector<1x8x4xf32>
    %15 = vector.shape_cast %14 : vector<1x8x4xf32> to vector<8x4xf32>
    %16 = vector.shape_cast %13 : vector<8x4xf32> to vector<1x8x4xf32>
    tpu.vector_store %arg7[%c0_12, %c0_13, %c0_14], %16 {strides = array<i32>} : memref<1x8x4xf32, #tpu.memory_space<vmem>>, vector<1x8x4xf32>,
    return
  }
  func.func @transform_0(%arg0: i32, %arg1: i32) -> (i32, i32, i32) {
    %c0_i32 = arith.constant 0 : i32
    %c0_i32_0 = arith.constant 0 : i32
    return %arg0, %arg1, %c0_i32 : i32, i32, i32
  }
  func.func @transform_1(%arg0: i32, %arg1: i32) -> (i32, i32, i32) {
    %c1_i32 = arith.constant 1 : i32
    %0 = arith.addi %arg1, %c1_i32 : i32
    %c1_i32_0 = arith.constant 1 : i32
    %1 = arith.muli %0, %c1_i32_0 : i32
    %c0_i32 = arith.constant 0 : i32
    %c0_i32_1 = arith.constant 0 : i32
    return %arg0, %1, %c0_i32 : i32, i32, i32
  }
  func.func @transform_2(%arg0: i32, %arg1: i32) -> (i32, i32) {
    %c0_i32 = arith.constant 0 : i32
    %c0_i32_0 = arith.constant 0 : i32
    %c0_i32_1 = arith.constant 0 : i32
    return %c0_i32, %c0_i32_0 : i32, i32
  }
  func.func @transform_3(%arg0: i32, %arg1: i32) -> (i32, i32) {
    %c0_i32 = arith.constant 0 : i32
    %c0_i32_0 = arith.constant 0 : i32
    %c0_i32_1 = arith.constant 0 : i32
    return %c0_i32, %c0_i32_0 : i32, i32
  }
  func.func @transform_4(%arg0: i32, %arg1: i32) -> (i32, i32) {
    %c0_i32 = arith.constant 0 : i32
    %c0_i32_0 = arith.constant 0 : i32
    %c0_i32_1 = arith.constant 0 : i32
    return %c0_i32, %c0_i32_0 : i32, i32
  }
  func.func @transform_5(%arg0: i32, %arg1: i32) -> (i32, i32, i32) {
    %c0_i32 = arith.constant 0 : i32
    %c0_i32_0 = arith.constant 0 : i32
    return %arg0, %arg1, %c0_i32 : i32, i32, i32
  }
}

</mosaic_0001>

<bundles_post_ra>
// kernel: tpu_custom_call.1
= control target key start
LH: loop header
LB: loop body
LE: loop exit
PB: predicated region body
PF: predicated region fallthrough
CT: control target
= control target key end

     0   :  { %s672_s18 = smov 0   ;;  %s674_s19 = smov 0   ;;  %s717_s0 = inlined_call_operand.vmem [shape: f32[2,16,8], index: 0, kind: input, shape index: {}]   ;;  %s718_s1 = inlined_call_operand.vmem [shape: f32[2,16,8], index: 1, kind: input, shape index: {}]   ;;  %s719_s2 = inlined_call_operand.vmem [shape: f32[8,4], index: 2, kind: input, shape index: {}]   ;;  %s720_s3 = inlined_call_operand.vmem [shape: f32[4,4], index: 3, kind: input, shape index: {}]   ;;  %s721_s4 = inlined_call_operand.vmem [shape: f32[1,4], index: 4, kind: input, shape index: {}]   ;;  %s722_s5 = inlined_call_operand.vmem [shape: f32[2,8,4], index: 5, kind: output, shape index: {}]  }
   0x1   :  { %s676_s20 = smov 0  }
   0x2 LB: > { %s27_s21 = sadd.s32 1, %s634_s19  ;;  %p560_p0 = scmp.ge.s32.totalorder %s638_s20, 1  ;;  %s638_s20 = sphi %s676_s20, %s15_s20   ;;  %s634_s19 = sphi %s674_s19, %s724_s19   ;;  %s630_s18 = sphi %s672_s18, %s723_s18  }
   0x3   : > { %p29_p1 = scmp.ge.s32.totalorder %s27_s21, 2  ;;  %p225_p2 = scmp.lt.s32.totalorder %s638_s20, 3 }
   0x5   : > { %s726_s21 = smov (%p29_p1, %s27_s21), 0  ;;  %p226_p3 = pnand %p560_p0, %p225_p2 }
   0x6   : > { %p267_p4 = scmp.lt.s32.totalorder (!%p226_p3), %s630_s18, 1 }
   0x7   : > { %229 = sbr.rel (%p226_p3) target bundleno = 218 (0xda), region = 40 }
   0xc   : > { %v293_v0 = vld [vmem:[%s719_s2] sm:$0xff]  ;;  %vm305_vm0 = vcmask 1043456   ;;  %v640_v1 = vmov 0.0   ;;  %vm641_vm1 = vmmov 0   ;;  %s728_s18 = smov (!%p267_p4, %s630_s18), 1  ;;  %vm379_vm2 = vcmask 64512  }
   0xd   : > { %585 = vmatprep.subr.mxu1 %v640_v1  ;;  %587 = vmatprep.mubr.msk.f32.mxu1 %vm641_vm1, %v640_v1  ;;  %v295_v2 = vld [vmem:[%s720_s3] sm:$0xf]  ;;  %s572_s26 = sshll.u32 %s728_s18, 4  ;;  %vm298_vm3 = vcmask 1046528   ;;  %vm302_vm4 = vcmask 31744   ;;  %s565_s9 = sshll.u32 %s728_s18, 3 }
   0xe   : > { %586 = vmatpush3.msra.mxu1 %v293_v0  ;;  %580 = vmatprep.subr.mxu0 %v640_v1  ;;  %s274_s29 = scalar_lea.vmem %s717_s0, %s572_s26  ;;  %s574_s30 = sadd.s32 8, %s572_s26  ;;  %v569_v11 = vld [vmem:[%s721_s4] ss:$0 sm:$0xff] }
   0xf   : > { %581 = vmatpush3.msk.msra.mxu0 %vm305_vm0, %v295_v2  ;;  %582 = vmatprep.mubr.msk.f32.mxu0 %vm641_vm1, %v640_v1  ;;  %s283_s8 = scalar_lea.vmem %s718_s1, %s574_s30  ;;  %v292_v3 = vld [vmem:[%s274_s29] sm:$0xff]  ;;  %s291_s14 = scalar_lea.vmem %s722_s5, %s565_s9 }
  0x10   : > { %v294_v4 = vld [vmem:[%s283_s8] sm:$0xff]  ;;  %v299_v5 = vrot.slane %v292_v3, 1  ;;  %588 = vmatmul.mubr.msk.f32.vlgmr.msra.gmra.mxu1 %vm379_vm2, %v292_v3 }
  0x11   : > { %v300_v6 = vrot.slane %v294_v4, 1 }
  0x13   : > { %v301_v7 = vsel %vm298_vm3, %v299_v5, %v300_v6 }
  0x14   : > { %583 = vmatmul.mubr.msk.f32.vlgmr.msra.gmra.mxu0 %vm302_vm4, %v301_v7 }
  0xd0   : > { %v448_v8 = vpop.f32.mrf.mxu1 }
  0xd2   : > { %v589_v9 = vpop.f32.mrf.mxu1 }
  0xd4   : > { %v375_v10 = vpop.f32.mrf.mxu0 }
  0xd5   : > { %v449_v12 = vadd.f32 %v448_v8, %v375_v10 }
  0xd6   : > { %v584_v13 = vpop.f32.mrf.mxu0 }
  0xd7   : > { %v459_v14 = vadd.f32 %v569_v11, %v449_v12 }
  0xd9   : > { %460 = vst.msk [vmem:[%s291_s14] sm:$0xff] %vm302_vm4, %v459_v14 }
  0xda PF: > { %s15_s20 = sadd.s32 1, %s638_s20   ;;  %s723_s18 = smov %s634_s19 }
  0xdb   : > { %p12_p5 = scmp.ge.s32.totalorder %s15_s20, 4   ;;  %s724_s19 = smov %s726_s21 }
  0xdd   :  { %14 = sbr.rel (!%p12_p5) target bundleno = 2 (0x2), region = 73 }

</bundles_post_ra>
